<compile_context>
chip_gen: v6e
topology: v6e:2x2x1
jax: 0.10.0
libtpu: 0.0.40
codegen_flags: <defaults>
</compile_context>

<pallas_src>
import functools

import jax
import jax.numpy as jnp
from jax.experimental import pallas as pl
from jax.experimental.pallas import tpu as pltpu


_BLOCK_BYTES = 2 * 1024 * 1024  # per-buffer tile target (~2 MiB, v5e-friendly)


def _vmem_limit(block_bytes):
    # double-buffered in + out + a few f32 temporaries, with headroom.
    need = 10 * block_bytes + (2 << 20)
    return int(min(max(need, 32 << 20), 48 << 20))


# --------------------------------------------------------------------------
# Kernels
# --------------------------------------------------------------------------

def _lrn_pointwise_kernel(x_ref, o_ref, *, alpha, beta):
    """n == 1 fast path: out = x * (1 + alpha*x^2)^(-beta), elementwise."""
    xf = x_ref[...].astype(jnp.float32)
    t = alpha * (xf * xf)
    o_ref[...] = (xf * jnp.exp(-beta * jnp.log(1.0 + t))).astype(o_ref.dtype)


def _lrn_within_kernel(x_ref, o_ref, *, n, alpha, beta):
    """Within-channel (spatial) LRN on a (tc, H, W) block; H, W are full."""
    tc, H, W = x_ref.shape
    pad = n // 2
    x = x_ref[...]
    xf = x.astype(jnp.float32)
    sq = xf * xf
    if pad == 0:
        acc = sq
    else:
        # Separable n x n box sum with zero padding (denominator stays n*n).
        zw = jnp.zeros((tc, H, pad), jnp.float32)
        sqw = jnp.concatenate([zw, sq, zw], axis=2)
        acc = sqw[:, :, 0:W]
        for j in range(1, n):
            acc = acc + sqw[:, :, j:j + W]
        zh = jnp.zeros((tc, pad, W), jnp.float32)
        acch = jnp.concatenate([zh, acc, zh], axis=1)
        acc = acch[:, 0:H, :]
        for i in range(1, n):
            acc = acc + acch[:, i:i + H, :]
    t = (alpha / float(n * n)) * acc
    o_ref[...] = (xf * jnp.exp(-beta * jnp.log(1.0 + t))).astype(o_ref.dtype)


def _lrn_across_kernel(x_ref, o_ref, *, n, alpha, beta):
    """Across-channel LRN on a (C, th, W) block; C is full (halo-free)."""
    C, th, W = x_ref.shape
    pad = n // 2
    x = x_ref[...]
    xf = x.astype(jnp.float32)
    sq = xf * xf
    if pad == 0:
        acc = sq
    else:
        zc = jnp.zeros((pad, th, W), jnp.float32)
        sqp = jnp.concatenate([zc, sq, zc], axis=0)
        acc = sqp[0:C]
        for i in range(1, n):
            acc = acc + sqp[i:i + C]
    t = (alpha / float(n)) * acc
    o_ref[...] = (xf * jnp.exp(-beta * jnp.log(1.0 + t))).astype(o_ref.dtype)


# --------------------------------------------------------------------------
# Wrappers (tiling / pallas_call)
# --------------------------------------------------------------------------

def _lrn_pointwise(x, alpha, beta):
    """n == 1: elementwise; present a lane-dense 2D view and tile rows."""
    shape, dtype = x.shape, x.dtype
    T = x.size
    L = None
    for cand in (2048, 1024, 512, 256, 128):
        if T % cand == 0:
            L = cand
            break
    if L is None:
        # Shape not 128-friendly; the blocked within-channel path handles n=1 too.
        return _lrn_within(x, 1, alpha, beta)
    R = T // L
    itemsize = jnp.dtype(dtype).itemsize
    tr = max(8, _BLOCK_BYTES // (L * itemsize))
    tr = min(tr, R)
    if tr >= 8:
        tr = (tr // 8) * 8
    x2 = x.reshape(R, L)
    kernel = functools.partial(_lrn_pointwise_kernel,
                               alpha=float(alpha), beta=float(beta))
    out = pl.pallas_call(
        kernel,
        out_shape=jax.ShapeDtypeStruct((R, L), dtype),
        grid=(pl.cdiv(R, tr),),
        in_specs=[pl.BlockSpec((tr, L), lambda r: (r, 0))],
        out_specs=pl.BlockSpec((tr, L), lambda r: (r, 0)),
        compiler_params=pltpu.CompilerParams(
            dimension_semantics=("parallel",),
            vmem_limit_bytes=_vmem_limit(tr * L * itemsize),
        ),
    )(x2)
    return out.reshape(shape)


def _lrn_within(x, n, alpha, beta):
    """Within-channel pooling: tile over (N, C); H, W stay whole (no halo)."""
    N, C, H, W = x.shape
    itemsize = jnp.dtype(x.dtype).itemsize
    plane_bytes = H * W * itemsize
    tc = max(1, min(C, _BLOCK_BYTES // max(plane_bytes, 1)))
    block = (None, tc, H, W)
    kernel = functools.partial(_lrn_within_kernel, n=n,
                               alpha=float(alpha), beta=float(beta))
    return pl.pallas_call(
        kernel,
        out_shape=jax.ShapeDtypeStruct(x.shape, x.dtype),
        grid=(N, pl.cdiv(C, tc)),
        in_specs=[pl.BlockSpec(block, lambda b, c: (b, c, 0, 0))],
        out_specs=pl.BlockSpec(block, lambda b, c: (b, c, 0, 0)),
        compiler_params=pltpu.CompilerParams(
            dimension_semantics=("parallel", "parallel"),
            vmem_limit_bytes=_vmem_limit(tc * plane_bytes),
        ),
    )(x)


def _lrn_across(x, n, alpha, beta):
    """Across-channel pooling: tile over (N, H); C stays whole (no halo)."""
    N, C, H, W = x.shape
    itemsize = jnp.dtype(x.dtype).itemsize
    full_bytes = C * H * W * itemsize
    if full_bytes <= _BLOCK_BYTES or H < 8:
        th = H
    else:
        row_bytes = C * W * itemsize
        th = min(H, max(8, (_BLOCK_BYTES // max(row_bytes, 1)) // 8 * 8))
    block = (None, C, th, W)
    kernel = functools.partial(_lrn_across_kernel, n=n,
                               alpha=float(alpha), beta=float(beta))
    return pl.pallas_call(
        kernel,
        out_shape=jax.ShapeDtypeStruct(x.shape, x.dtype),
        grid=(N, pl.cdiv(H, th)),
        in_specs=[pl.BlockSpec(block, lambda b, h: (b, 0, h, 0))],
        out_specs=pl.BlockSpec(block, lambda b, h: (b, 0, h, 0)),
        compiler_params=pltpu.CompilerParams(
            dimension_semantics=("parallel", "parallel"),
            vmem_limit_bytes=_vmem_limit(C * th * W * itemsize),
        ),
    )(x)


def lrn(x, n=1, alpha=1.0, beta=0.75, across_channels=False):
    """Pallas LRN forward. x: (N, C, H, W)."""
    assert x.ndim == 4
    assert n % 2 == 1, "even n changes output shape in the PyTorch module; unsupported"
    if n == 1:
        # Window of 1 -> identical formula for both modes; pure elementwise.
        return _lrn_pointwise(x, alpha, beta)
    if across_channels:
        return _lrn_across(x, n, alpha, beta)
    return _lrn_within(x, n, alpha, beta)


# --------------------------------------------------------------------------
# Pure-JAX reference (matches the PyTorch module)
# --------------------------------------------------------------------------

def lrn_ref(x, n=1, alpha=1.0, beta=0.75, across_channels=False):
    N, C, H, W = x.shape
    pad = n // 2
    sq = x.astype(jnp.float32) ** 2
    if across_channels:
        sqp = jnp.pad(sq, ((0, 0), (pad, pad), (0, 0), (0, 0)))
        div = sum(sqp[:, i:i + C] for i in range(n)) / n
    else:
        sqp = jnp.pad(sq, ((0, 0), (0, 0), (pad, pad), (pad, pad)))
        div = sum(sqp[:, :, i:i + H, j:j + W]
                  for i in range(n) for j in range(n)) / (n * n)
    div = (1.0 + alpha * div) ** beta
    return (x.astype(jnp.float32) / div).astype(x.dtype)


if __name__ == "__main__":
    key = jax.random.PRNGKey(0)
    x = jax.random.normal(key, (2, 4, 16, 16), dtype=jnp.float32)

    # 1) Default module config: n=1, alpha=1.0, beta=0.75, ACROSS_CHANNELS=False.
    out = lrn(x, n=1, alpha=1.0, beta=0.75, across_channels=False)
    jax.block_until_ready(out)
    ref = lrn_ref(x, n=1, alpha=1.0, beta=0.75, across_channels=False)
    assert jnp.allclose(out, ref, atol=1e-5, rtol=1e-5), "n=1 fast path mismatch"

    # 2) ACROSS_CHANNELS=True, n=3 (vectorized channel-window average).
    out_ac = lrn(x, n=3, alpha=1.0, beta=0.75, across_channels=True)
    jax.block_until_ready(out_ac)
    ref_ac = lrn_ref(x, n=3, alpha=1.0, beta=0.75, across_channels=True)
    assert jnp.allclose(out_ac, ref_ac, atol=1e-5, rtol=1e-5), "across-channel mismatch"

    # 3) Within-channel spatial pooling, n=3 (separable accumulation).
    out_wc = lrn(x, n=3, alpha=1.0, beta=0.75, across_channels=False)
    jax.block_until_ready(out_wc)
    ref_wc = lrn_ref(x, n=3, alpha=1.0, beta=0.75, across_channels=False)
    assert jnp.allclose(out_wc, ref_wc, atol=1e-5, rtol=1e-5), "within-channel mismatch"

    # 4) Non-128-friendly shape exercises the blocked n=1 fallback.
    x_odd = jax.random.normal(jax.random.PRNGKey(1), (1, 3, 7, 9), dtype=jnp.float32)
    out_odd = lrn(x_odd, n=1, alpha=1.0, beta=0.75, across_channels=False)
    jax.block_until_ready(out_odd)
    ref_odd = lrn_ref(x_odd, n=1, alpha=1.0, beta=0.75, across_channels=False)
    assert jnp.allclose(out_odd, ref_odd, atol=1e-5, rtol=1e-5), "fallback mismatch"

    print("KERNEL_OK")
</pallas_src>

<mosaic_0001>
module attributes {stable_mosaic.version = 11 : i64} {
  func.func @_lrn_pointwise_kernel(%arg0: i32, %arg1: memref<1x2048xf32, #tpu.memory_space<vmem>>, %arg2: memref<1x2048xf32, #tpu.memory_space<vmem>>) attributes {dimension_semantics = [#tpu.dimension_semantics<parallel>], iteration_bounds = array<i64: 1>, scalar_prefetch = 0 : i64, scratch_operands = 0 : i64, tpu.core_type = #tpu.core_type<tc>, window_params = [{transform_indices = @transform_0, window_bounds = array<i64: 1, 2048>}, {transform_indices = @transform_1, window_bounds = array<i64: 1, 2048>}]} {
    %c0 = arith.constant 0 : index
    %c0_0 = arith.constant 0 : index
    %0 = vector.load %arg1[%c0, %c0_0] : memref<1x2048xf32, #tpu.memory_space<vmem>>, vector<1x2048xf32>
    %1 = arith.mulf %0, %0 : vector<1x2048xf32>
    %cst = arith.constant 1.000000e+00 : f32
    %2 = vector.broadcast %cst : f32 to vector<1x2048xf32>
    %3 = arith.mulf %2, %1 : vector<1x2048xf32>
    %cst_1 = arith.constant 1.000000e+00 : f32
    %4 = vector.broadcast %cst_1 : f32 to vector<1x2048xf32>
    %5 = arith.addf %4, %3 : vector<1x2048xf32>
    %6 = math.log %5 : vector<1x2048xf32>
    %cst_2 = arith.constant -7.500000e-01 : f32
    %7 = vector.broadcast %cst_2 : f32 to vector<1x2048xf32>
    %8 = arith.mulf %7, %6 : vector<1x2048xf32>
    %9 = math.exp %8 : vector<1x2048xf32>
    %10 = arith.mulf %0, %9 : vector<1x2048xf32>
    %c0_3 = arith.constant 0 : index
    %c0_4 = arith.constant 0 : index
    %11 = vector.load %arg2[%c0_3, %c0_4] : memref<1x2048xf32, #tpu.memory_space<vmem>>, vector<1x2048xf32>
    tpu.vector_store %arg2[%c0_3, %c0_4], %10 {strides = array<i32>} : memref<1x2048xf32, #tpu.memory_space<vmem>>, vector<1x2048xf32>,
    return
  }
  func.func @transform_0(%arg0: i32) -> (i32, i32) {
    %c0_i32 = arith.constant 0 : i32
    %c0_i32_0 = arith.constant 0 : i32
    return %arg0, %c0_i32 : i32, i32
  }
  func.func @transform_1(%arg0: i32) -> (i32, i32) {
    %c0_i32 = arith.constant 0 : i32
    %c0_i32_0 = arith.constant 0 : i32
    return %arg0, %c0_i32 : i32, i32
  }
}

</mosaic_0001>

<bundles_post_ra>
// kernel: tpu_custom_call.1
= control target key start
LH: loop header
LB: loop body
LE: loop exit
PB: predicated region body
PF: predicated region fallthrough
CT: control target
= control target key end

     0   :  { %6 = vsyncpa [#allocation3], 0  ;;  %s128_s0 = inlined_call_operand.hbm [shape: f32[1,2048], index: 0, kind: input, shape index: {}]   ;;  %s129_s1 = inlined_call_operand.hbm [shape: f32[1,2048], index: 1, kind: output, shape index: {}]  }
   0x1   :  { %7 = vsyncpa [#allocation4], 0  ;;  %s110_s6 = smov [#allocation2]  }
   0x2   :  { %s14_s7 = sshll.u32 %s110_s6, 4  ;;  %s15_s7 = int_to_ptr.vmem [resolvable:$true] %s14_s7 }
   0x3   :  { %s74_s8 = scalar_lea.vmem %s15_s7, 256  ;;  %p79_p1 = scmp.lt.s32.totalorder %s15_s7, %s15_s7 }
   0x4   :  { %p75_p0 = scmp.ne.s32.totalorder %s15_s7, %s74_s8  ;;  %p80_p2 = scmp.lt.s32.totalorder %s74_s8, %s74_s8 }
   0x6   :  { %p81_p3 = por %p80_p2, %p79_p1 }
   0x8   :  { %p82_p4 = pnand %p81_p3, %p75_p0 }
   0xa   :  { %85 = shalt.err (!%p82_p4)
}
   0xb   :  { %17 = dma.hbm_to_vmem [thread:$0]  %s128_s0, 256, %s15_s7, [#allocation3]  }
   0xc   :  { %106 = dma.done.wait [#allocation3], 256  }
   0xd   :  { %107 = vsyncadd [#allocation3], 4294967040  ;;  %v21_v0 = vld [vmem:[#allocation2] sm:$0xff]  ;;  %v22_v1 = vld [vmem:[#allocation2 + $0x8] sm:$0xff]  ;;  %s111_s0 = smov [#allocation5]  }
   0xe   :  { %v23_v2 = vmul.f32 %v21_v0, %v21_v0  ;;  %v24_v3 = vmul.f32 %v22_v1, %v22_v1  ;;  %s47_s11 = sshll.u32 %s111_s0, 4  ;;  %s48_s11 = int_to_ptr.vmem [resolvable:$true] %s47_s11 }
   0xf   :  { %s86_s12 = scalar_lea.vmem %s48_s11, 256  ;;  %p91_p6 = scmp.lt.s32.totalorder %s48_s11, %s48_s11 }
  0x10   :  { %v25_v4 = vadd.f32 1.0, %v23_v2  ;;  %v26_v5 = vadd.f32 1.0, %v24_v3  ;;  %p87_p5 = scmp.ne.s32.totalorder %s48_s11, %s86_s12  ;;  %p92_p7 = scmp.lt.s32.totalorder %s86_s12, %s86_s12 }
  0x12   :  { %58 = vlog2.f32 %v25_v4  ;;  %p93_p8 = por %p92_p7, %p91_p6 }
  0x13   :  { %60 = vlog2.f32 %v26_v5 }
  0x14   :  { %p94_p9 = pnand %p93_p8, %p87_p5 }
  0x1f   :  { %v59_v6 = vpop.eup %58 }
  0x20   :  { %v61_v7 = vpop.eup %60  ;;  %v28_v8 = vmul.f32 0.6931472, %v59_v6 }
  0x21   :  { %v30_v9 = vmul.f32 0.6931472, %v61_v7 }
  0x22   :  { %v31_v10 = vmul.f32 -0.75, %v28_v8 }
  0x23   :  { %v32_v11 = vmul.f32 -0.75, %v30_v9 }
  0x24   :  { %v33_v12 = vmul.f32 1.442695, %v31_v10 }
  0x25   :  { %v35_v13 = vmul.f32 1.442695, %v32_v11 }
  0x26   :  { %62 = vpow2.f32 %v33_v12 }
  0x27   :  { %64 = vpow2.f32 %v35_v13 }
  0x33   :  { %v63_v14 = vpop.eup %62 }
  0x34   :  { %v65_v15 = vpop.eup %64  ;;  %v37_v16 = vmul.f32 %v63_v14, %v21_v0 }
  0x35   :  { %v38_v17 = vmul.f32 %v65_v15, %v22_v1 }
  0x36   :  { %39 = vst [vmem:[#allocation5] sm:$0xff] %v37_v16 }
  0x37   :  { %40 = vst [vmem:[#allocation5 + $0x8] sm:$0xff] %v38_v17 }
  0x38   :  { %97 = shalt.err (!%p94_p9)
}
  0x39   :  { %50 = dma.vmem_to_hbm [thread:$0]  %s48_s11, 256, %s129_s1, [#allocation4]  }
  0x3a   :  { %108 = dma.done.wait [#allocation4], 256  }
  0x3b   :  { %109 = vsyncadd [#allocation4], 4294967040 }
  0x3c   :  { %54 = vsyncpa [#allocation3], 1 }
  0x3d   :  { %55 = vsyncpa [#allocation4], 1 }

</bundles_post_ra>
